<compile_context>
chip_gen: v7x
topology: tpu7x:2x2x1
jax: 0.10.0
libtpu: 0.0.40
codegen_flags: <defaults>
</compile_context>

<pallas_src>
import functools

import jax
import jax.numpy as jnp
from jax import lax
from jax.experimental import pallas as pl
from jax.experimental.pallas import tpu as pltpu


# Tables at or below this size are loaded wholesale into VMEM (fast path).
_TABLE_VMEM_BYTES = 4 * 1024 * 1024
# Per-output-block VMEM budget (the block is double-buffered by the pipeline).
_OUT_BLOCK_BYTES = 2 * 1024 * 1024


def _gather_vmem_kernel(idx_ref, table_ref, out_ref, *, tokens_per_block):
    """Small-table fast path: whole table resident in VMEM, in-VMEM row gather.

    idx_ref   : SMEM (n_pad,) int32 — scalar-prefetched token ids (all tokens)
    table_ref : VMEM (V, H)         — full embedding table (constant block)
    out_ref   : VMEM (TN, H)        — output block for this grid step
    """
    base = pl.program_id(0) * tokens_per_block

    def gather_one(t, carry):
        row = idx_ref[base + t]
        out_ref[pl.ds(t, 1), :] = table_ref[pl.ds(row, 1), :]
        return carry

    lax.fori_loop(0, tokens_per_block, gather_one, 0,
                  unroll=True if tokens_per_block <= 64 else 8)


def _gather_hbm_kernel(idx_ref, table_hbm, out_ref, sem, *, tokens_per_block):
    """Large-table path: per-row HBM DMAs straight into the output block.

    idx_ref   : SMEM (n_pad,) int32 — scalar-prefetched token ids
    table_hbm : HBM  (V, H)         — embedding table (raw HBM ref, no auto-DMA)
    out_ref   : VMEM (TN, H)        — output block; direct DMA destination
    sem       : single DMA semaphore shared by all row copies of this step
    """
    base = pl.program_id(0) * tokens_per_block

    def issue(t, carry):
        row = idx_ref[base + t]
        pltpu.make_async_copy(
            table_hbm.at[pl.ds(row, 1), :],
            out_ref.at[pl.ds(t, 1), :],
            sem,
        ).start()
        return carry

    # Partial unroll keeps the DMA-descriptor (vector-misc) slot fed without
    # blowing up the bundle stream / compile time at large TN.
    lax.fori_loop(0, tokens_per_block, issue, 0,
                  unroll=True if tokens_per_block <= 32 else 8)

    # All row copies signal the same semaphore.  One aggregate wait whose
    # descriptor spans the full (TN, H) destination; .wait() only uses the
    # destination byte count and the semaphore (the source ref is ignored),
    # so this waits for exactly TN * H * itemsize gathered bytes.
    pltpu.make_async_copy(out_ref, out_ref, sem).wait()


def _choose_tokens_per_block(n_tokens, hidden, itemsize, requested):
    """Pick TN: big enough to amortize grid-step overhead, small enough for
    VMEM on every generation, and keeping >= 2 grid steps for v7x megacore."""
    max_tn_vmem = max(8, (_OUT_BLOCK_BYTES // max(1, hidden * itemsize)) // 8 * 8)
    if requested is not None:
        return max(8, (min(int(requested), max_tn_vmem) // 8) * 8)
    tn = min(256, max_tn_vmem)
    if n_tokens > 8:
        half_up = (((n_tokens + 1) // 2) + 7) // 8 * 8   # ceil(N/2) rounded to 8
        tn = min(tn, max(8, half_up))
    return max(8, tn)


def embedding_lookup(source, embedding_table, *, tokens_per_block=None):
    """nn.Embedding(source) as a Pallas gather kernel (dtype-generic)."""
    B, S = source.shape
    V, H = embedding_table.shape
    dtype = embedding_table.dtype
    itemsize = jnp.dtype(dtype).itemsize
    N = B * S

    tn = _choose_tokens_per_block(N, H, itemsize, tokens_per_block)
    n_pad = pl.cdiv(N, tn) * tn
    grid = (n_pad // tn,)

    # Clamp once, vectorized, in the wrapper (out-of-range ids would otherwise
    # fault the DMA; PyTorch raises — inputs are assumed in-range).
    idx = jnp.clip(source.reshape(N).astype(jnp.int32), 0, V - 1)
    if n_pad != N:
        # Padded tokens gather row 0 (the padding row) and are sliced off below.
        idx = jnp.pad(idx, (0, n_pad - N))

    table_bytes = V * H * itemsize
    use_vmem_table = table_bytes <= _TABLE_VMEM_BYTES

    if use_vmem_table:
        kernel = functools.partial(_gather_vmem_kernel, tokens_per_block=tn)
        in_specs = [pl.BlockSpec((V, H), lambda i, ids: (0, 0))]  # bulk table DMA
        scratch_shapes = []
    else:
        kernel = functools.partial(_gather_hbm_kernel, tokens_per_block=tn)
        in_specs = [pl.BlockSpec(memory_space=pl.ANY)]            # table stays in HBM
        scratch_shapes = [pltpu.SemaphoreType.DMA]                # one shared sem

    bytes_accessed = 2 * n_pad * H * itemsize + n_pad * 4
    if use_vmem_table:
        bytes_accessed += table_bytes

    out_flat = pl.pallas_call(
        kernel,
        out_shape=jax.ShapeDtypeStruct((n_pad, H), dtype),
        grid_spec=pltpu.PrefetchScalarGridSpec(
            num_scalar_prefetch=1,                                # token ids -> SMEM
            grid=grid,
            in_specs=in_specs,
            out_specs=pl.BlockSpec((tn, H), lambda i, ids: (i, 0)),
            scratch_shapes=scratch_shapes,
        ),
        compiler_params=pltpu.CompilerParams(
            dimension_semantics=("parallel",),                    # v7x: both TCs
        ),
        cost_estimate=pl.CostEstimate(
            flops=0, transcendentals=0, bytes_accessed=int(bytes_accessed)),
    )(idx, embedding_table)

    return out_flat[:N].reshape(B, S, H)


def encoder_forward(source, embedding_table):
    """Mirrors Encoder.forward: resets before_hidden and embeds `source`.

    The PyTorch forward stores `before_hidden` as a side effect and returns
    None; we return the computed (embedded, before_hidden) tensors instead.
    """
    B, _ = source.shape
    _, H = embedding_table.shape

    embedded = embedding_lookup(source, embedding_table)

    # Encoder.clear(): zero "before_hidden" buffer — plain JAX glue, no hot path.
    before_hidden = jnp.zeros((B, H), dtype=embedding_table.dtype)

    return embedded, before_hidden


if __name__ == "__main__":
    # Small shapes consistent with the module: batch=2, seq=8, vocab=64, hidden=32.
    # (64 x 32 f32 table = 8 KiB -> exercises the VMEM-resident fast path.)
    batch_size, seq_len, vocab_size, hidden_size = 2, 8, 64, 32

    key = jax.random.PRNGKey(0)
    k_w, k_src = jax.random.split(key)

    # nn.Embedding default init ~ N(0, 1); padding_idx=0 zeroes row 0.
    table = jax.random.normal(k_w, (vocab_size, hidden_size), dtype=jnp.float32)
    table = table.at[0].set(0.0)

    source = jax.random.randint(k_src, (batch_size, seq_len), 0, vocab_size,
                                dtype=jnp.int32)

    embedded, before_hidden = encoder_forward(source, table)
    embedded = jax.block_until_ready(embedded)
    before_hidden = jax.block_until_ready(before_hidden)

    # Reference check against a plain-JAX gather (same semantics as nn.Embedding).
    ref = jnp.take(table, source, axis=0)
    assert embedded.shape == (batch_size, seq_len, hidden_size)
    assert before_hidden.shape == (batch_size, hidden_size)
    assert jnp.array_equal(embedded, ref), "embedding mismatch"  # exact row copies
    assert bool(jnp.all(before_hidden == 0.0))

    print("KERNEL_OK")
</pallas_src>

<mosaic_0001>
module attributes {stable_mosaic.version = 11 : i64} {
  func.func @_gather_vmem_kernel(%arg0: i32, %arg1: memref<16xi32, #tpu.memory_space<smem>>, %arg2: memref<64x32xf32, #tpu.memory_space<vmem>>, %arg3: memref<8x32xf32, #tpu.memory_space<vmem>>) attributes {dimension_semantics = [#tpu.dimension_semantics<parallel>], iteration_bounds = array<i64: 2>, scalar_prefetch = 1 : i64, scratch_operands = 0 : i64, tpu.core_type = #tpu.core_type<tc>, window_params = [{pipeline_mode = #tpu.pipeline_mode<synchronous>, transform_indices = @transform_0, window_bounds = array<i64: 64, 32>}, {transform_indices = @transform_1, window_bounds = array<i64: 8, 32>}]} {
    %c8_i32 = arith.constant 8 : i32
    %0 = arith.muli %arg0, %c8_i32 : i32
    %c0_i32 = arith.constant 0 : i32
    %1 = arith.addi %0, %c0_i32 : i32
    %2 = arith.index_cast %1 : i32 to index
    %3 = memref.load %arg1[%2] : memref<16xi32, #tpu.memory_space<smem>>
    %4 = arith.index_cast %3 : i32 to index
    %c0 = arith.constant 0 : index
    %5 = vector.load %arg2[%4, %c0] : memref<64x32xf32, #tpu.memory_space<vmem>>, vector<1x32xf32>
    %6 = arith.index_cast %c0_i32 : i32 to index
    %c0_0 = arith.constant 0 : index
    %7 = vector.load %arg3[%6, %c0_0] : memref<8x32xf32, #tpu.memory_space<vmem>>, vector<1x32xf32>
    tpu.vector_store %arg3[%6, %c0_0], %5 {strides = array<i32>} : memref<8x32xf32, #tpu.memory_space<vmem>>, vector<1x32xf32>,
    %c1_i32 = arith.constant 1 : i32
    %8 = arith.addi %0, %c1_i32 : i32
    %9 = arith.index_cast %8 : i32 to index
    %10 = memref.load %arg1[%9] : memref<16xi32, #tpu.memory_space<smem>>
    %11 = arith.index_cast %10 : i32 to index
    %c0_1 = arith.constant 0 : index
    %12 = vector.load %arg2[%11, %c0_1] : memref<64x32xf32, #tpu.memory_space<vmem>>, vector<1x32xf32>
    %13 = arith.index_cast %c1_i32 : i32 to index
    %c0_2 = arith.constant 0 : index
    %14 = vector.load %arg3[%13, %c0_2] : memref<8x32xf32, #tpu.memory_space<vmem>>, vector<1x32xf32>
    tpu.vector_store %arg3[%13, %c0_2], %12 {strides = array<i32>} : memref<8x32xf32, #tpu.memory_space<vmem>>, vector<1x32xf32>,
    %c2_i32 = arith.constant 2 : i32
    %15 = arith.addi %0, %c2_i32 : i32
    %16 = arith.index_cast %15 : i32 to index
    %17 = memref.load %arg1[%16] : memref<16xi32, #tpu.memory_space<smem>>
    %18 = arith.index_cast %17 : i32 to index
    %c0_3 = arith.constant 0 : index
    %19 = vector.load %arg2[%18, %c0_3] : memref<64x32xf32, #tpu.memory_space<vmem>>, vector<1x32xf32>
    %20 = arith.index_cast %c2_i32 : i32 to index
    %c0_4 = arith.constant 0 : index
    %21 = vector.load %arg3[%20, %c0_4] : memref<8x32xf32, #tpu.memory_space<vmem>>, vector<1x32xf32>
    tpu.vector_store %arg3[%20, %c0_4], %19 {strides = array<i32>} : memref<8x32xf32, #tpu.memory_space<vmem>>, vector<1x32xf32>,
    %c3_i32 = arith.constant 3 : i32
    %22 = arith.addi %0, %c3_i32 : i32
    %23 = arith.index_cast %22 : i32 to index
    %24 = memref.load %arg1[%23] : memref<16xi32, #tpu.memory_space<smem>>
    %25 = arith.index_cast %24 : i32 to index
    %c0_5 = arith.constant 0 : index
    %26 = vector.load %arg2[%25, %c0_5] : memref<64x32xf32, #tpu.memory_space<vmem>>, vector<1x32xf32>
    %27 = arith.index_cast %c3_i32 : i32 to index
    %c0_6 = arith.constant 0 : index
    %28 = vector.load %arg3[%27, %c0_6] : memref<8x32xf32, #tpu.memory_space<vmem>>, vector<1x32xf32>
    tpu.vector_store %arg3[%27, %c0_6], %26 {strides = array<i32>} : memref<8x32xf32, #tpu.memory_space<vmem>>, vector<1x32xf32>,
    %c4_i32 = arith.constant 4 : i32
    %29 = arith.addi %0, %c4_i32 : i32
    %30 = arith.index_cast %29 : i32 to index
    %31 = memref.load %arg1[%30] : memref<16xi32, #tpu.memory_space<smem>>
    %32 = arith.index_cast %31 : i32 to index
    %c0_7 = arith.constant 0 : index
    %33 = vector.load %arg2[%32, %c0_7] : memref<64x32xf32, #tpu.memory_space<vmem>>, vector<1x32xf32>
    %34 = arith.index_cast %c4_i32 : i32 to index
    %c0_8 = arith.constant 0 : index
    %35 = vector.load %arg3[%34, %c0_8] : memref<8x32xf32, #tpu.memory_space<vmem>>, vector<1x32xf32>
    tpu.vector_store %arg3[%34, %c0_8], %33 {strides = array<i32>} : memref<8x32xf32, #tpu.memory_space<vmem>>, vector<1x32xf32>,
    %c5_i32 = arith.constant 5 : i32
    %36 = arith.addi %0, %c5_i32 : i32
    %37 = arith.index_cast %36 : i32 to index
    %38 = memref.load %arg1[%37] : memref<16xi32, #tpu.memory_space<smem>>
    %39 = arith.index_cast %38 : i32 to index
    %c0_9 = arith.constant 0 : index
    %40 = vector.load %arg2[%39, %c0_9] : memref<64x32xf32, #tpu.memory_space<vmem>>, vector<1x32xf32>
    %41 = arith.index_cast %c5_i32 : i32 to index
    %c0_10 = arith.constant 0 : index
    %42 = vector.load %arg3[%41, %c0_10] : memref<8x32xf32, #tpu.memory_space<vmem>>, vector<1x32xf32>
    tpu.vector_store %arg3[%41, %c0_10], %40 {strides = array<i32>} : memref<8x32xf32, #tpu.memory_space<vmem>>, vector<1x32xf32>,
    %c6_i32 = arith.constant 6 : i32
    %43 = arith.addi %0, %c6_i32 : i32
    %44 = arith.index_cast %43 : i32 to index
    %45 = memref.load %arg1[%44] : memref<16xi32, #tpu.memory_space<smem>>
    %46 = arith.index_cast %45 : i32 to index
    %c0_11 = arith.constant 0 : index
    %47 = vector.load %arg2[%46, %c0_11] : memref<64x32xf32, #tpu.memory_space<vmem>>, vector<1x32xf32>
    %48 = arith.index_cast %c6_i32 : i32 to index
    %c0_12 = arith.constant 0 : index
    %49 = vector.load %arg3[%48, %c0_12] : memref<8x32xf32, #tpu.memory_space<vmem>>, vector<1x32xf32>
    tpu.vector_store %arg3[%48, %c0_12], %47 {strides = array<i32>} : memref<8x32xf32, #tpu.memory_space<vmem>>, vector<1x32xf32>,
    %c7_i32 = arith.constant 7 : i32
    %50 = arith.addi %0, %c7_i32 : i32
    %51 = arith.index_cast %50 : i32 to index
    %52 = memref.load %arg1[%51] : memref<16xi32, #tpu.memory_space<smem>>
    %53 = arith.index_cast %52 : i32 to index
    %c0_13 = arith.constant 0 : index
    %54 = vector.load %arg2[%53, %c0_13] : memref<64x32xf32, #tpu.memory_space<vmem>>, vector<1x32xf32>
    %55 = arith.index_cast %c7_i32 : i32 to index
    %c0_14 = arith.constant 0 : index
    %56 = vector.load %arg3[%55, %c0_14] : memref<8x32xf32, #tpu.memory_space<vmem>>, vector<1x32xf32>
    tpu.vector_store %arg3[%55, %c0_14], %54 {strides = array<i32>} : memref<8x32xf32, #tpu.memory_space<vmem>>, vector<1x32xf32>,
    %c8_i32_15 = arith.constant 8 : i32
    return
  }
  func.func @transform_0(%arg0: i32, %arg1: memref<16xi32, #tpu.memory_space<smem>>) -> (i32, i32) {
    %c0_i32 = arith.constant 0 : i32
    %c0_i32_0 = arith.constant 0 : i32
    %c0_i32_1 = arith.constant 0 : i32
    return %c0_i32, %c0_i32_0 : i32, i32
  }
  func.func @transform_1(%arg0: i32, %arg1: memref<16xi32, #tpu.memory_space<smem>>) -> (i32, i32) {
    %c0_i32 = arith.constant 0 : i32
    %c0_i32_0 = arith.constant 0 : i32
    return %arg0, %c0_i32 : i32, i32
  }
}

</mosaic_0001>

<bundles_post_ra>
// kernel: tpu_custom_call.1
= control target key start
LH: loop header
LB: loop body
LE: loop exit
PB: predicated region body
PF: predicated region fallthrough
CT: control target
= control target key end

     0   :  { %s491_s0 = inlined_call_operand.vmem [shape: s32[16], index: 0, kind: input, shape index: {}]   ;;  %s492_s1 = inlined_call_operand.vmem [shape: f32[64,32], index: 1, kind: input, shape index: {}]   ;;  %s493_s2 = inlined_call_operand.hbm [shape: f32[16,32], index: 2, kind: output, shape index: {}]  }
   0x1   :  { %s7_s11 = sshll.u32 %s491_s0, 4  ;;  %s8_s11 = int_to_ptr.vmem [resolvable:$true] %s7_s11 }
   0x2   :  { %s261_s12 = scalar_lea.vmem %s8_s11, 16  ;;  %p266_p1 = scmp.lt.s32.totalorder %s8_s11, %s8_s11 }
   0x3   :  { %p262_p0 = scmp.ne.s32.totalorder %s8_s11, %s261_s12  ;;  %p267_p2 = scmp.lt.s32.totalorder %s261_s12, %s261_s12 }
   0x5   :  { %p268_p3 = por %p267_p2, %p266_p1 }
   0x7   :  { %p269_p4 = pnand %p268_p3, %p262_p0 }
   0x9   :  { %272 = shalt.err (!%p269_p4)  }
   0xa   :  { %s339_s13 = smov [#allocation3]  }
   0xb   :  { %10 = dma.vmem_to_smem %s8_s11, 16, %s339_s13, [#allocation2] }
   0xc   :  { %317 = dma.done.wait [#allocation2], 16 }
   0xd   :  { %318 = vsyncadd [#allocation2], 4294967280 }
   0xe   :  { %12 = sfence }
   0xf   :  { %13 = vsyncpa [#allocation5], 0 }
  0x10   :  { %15 = vsyncpa [#allocation5 + $0x1], 0  ;;  %s359_s14 = smov 0   ;;  %s361_s15 = smov 0  }
  0x11   :  { %s363_s0 = smov 0   ;;  %s365_s16 = smov 0  }
  0x12 LB: > { %496 = sst [smem:[#allocation8_spill]] %s333_s0  ;;  %s380_s17 = sadd.s32 4294967295, %s337_s16   ;;  %s337_s16 = sphi %s365_s16, %s505_s16   ;;  %s333_s0 = sphi %s363_s0, %s502_s0   ;;  %s329_s15 = sphi %s361_s15, %s504_s15   ;;  %s325_s14 = sphi %s359_s14, %s503_s14  }
  0x13   : > { %s212_s18 = sadd.s32 4294967294, %s337_s16   ;;  %s384_s19 = sadd.s32 1, %s337_s16  }
  0x14   : > { %s49_s20 = sadd.s32 1, %s333_s0  ;;  %s46_s21 = ssub.s32 %s337_s16, %s384_s19 }
  0x15   : > { %p59_p5 = scmp.ne.s32.totalorder %s333_s0, %s329_s15  ;;  %p47_p6 = scmp.eq.s32.totalorder %s46_s21, 0 }
  0x16   : > { %p60_p7 = scmp.eq.s32.totalorder %s380_s17, 1  ;;  %p65_p8 = scmp.ne.s32.totalorder %s329_s15, %s325_s14 }
  0x17   : > { %p66_p9 = scmp.eq.s32.totalorder %s212_s18, 1  ;;  %p214_p12 = scmp.ge.s32.totalorder %s337_s16, 1 }
  0x18   : > { %s395_s22 = scalar_select %p47_p6, %s333_s0, %s49_s20  }
  0x19   : > { %p397_p10 = por %p60_p7, %p59_p5  ;;  %p401_p11 = por %p66_p9, %p65_p8 }
  0x1a   : > { %497 = sst [smem:[#allocation9_spill]] %s395_s22  ;;  %p87_p13 = scmp.lt.s32.totalorder %s337_s16, 3 }
  0x1c   : > { %p88_p0 = pnand %p214_p12, %p87_p13 }
  0x1d   : > { %s494_s25 = sand.u32 (!%p88_p0), 1, %s329_s15   ;;  %s216_s26 = sshll.u32 (!%p88_p0), %s380_s17, 3  ;;  %vm106_vm0 = vcmask (!%p88_p0), 253952  }
  0x1e   : > { %91 = sbr.rel (%p88_p0) target bundleno = 68 (0x44), region = 24  ;;  %s215_s27 = sshll.u32 (!%p88_p0), %s494_s25, 3 }
  0x1f   : > { %s103_s28 = sld [smem:[#allocation3 + %s216_s26]] (!%p88_p0)  ;;  %s108_s29 = sadd.s32 (!%p88_p0), 1, %s216_s26 }
  0x20   : > { %s113_s30 = sadd.s32 (!%p88_p0), 2, %s216_s26  ;;  %s109_s3 = sld [smem:[#allocation3 + %s108_s29]] (!%p88_p0) }
  0x21   : > { %s114_s4 = sld [smem:[#allocation3 + %s113_s30]] (!%p88_p0)  ;;  %s118_s5 = sadd.s32 (!%p88_p0), 3, %s216_s26 }
  0x22   : > { %s123_s6 = sadd.s32 (!%p88_p0), 4, %s216_s26  ;;  %s119_s7 = sld [smem:[#allocation3 + %s118_s5]] (!%p88_p0) }
  0x23   : > { %s124_s8 = sld [smem:[#allocation3 + %s123_s6]] (!%p88_p0)  ;;  %s128_s12 = sadd.s32 (!%p88_p0), 5, %s216_s26 }
  0x24   : > { %s129_s13 = sld [smem:[#allocation3 + %s128_s12]] (!%p88_p0)  ;;  %s133_s18 = sadd.s32 (!%p88_p0), 6, %s216_s26 }
  0x25   : > { %s104_s11 = scalar_lea.vmem %s492_s1, %s103_s28  ;;  %s101_s20 = scalar_lea.vmem [#allocation4], %s215_s27 }
  0x26   : > { %v105_v0 = vld [vmem:[%s104_s11] sm:$0x1]  ;;  %s134_s21 = sld [smem:[#allocation3 + %s133_s18]]  ;;  %s138_s29 = sadd.s32 7, %s216_s26 }
  0x27   : > { %107 = vst.msk [vmem:[%s101_s20] sm:$0x1] %vm106_vm0, %v105_v0  ;;  %s110_s22 = scalar_lea.vmem %s492_s1, %s109_s3  ;;  %s115_s0 = scalar_lea.vmem %s492_s1, %s114_s4 }
  0x28   : > { %v111_v1 = vld [vmem:[%s110_s22] sm:$0x1]  ;;  %s139_s28 = sld [smem:[#allocation3 + %s138_s29]]  ;;  %s120_s10 = scalar_lea.vmem %s492_s1, %s119_s7 }
  0x29   : > { %v116_v2 = vld [vmem:[%s115_s0] sm:$0x1]  ;;  %112 = vst.msk [vmem:[%s101_s20 + $0x1] sm:$0x1] %vm106_vm0, %v111_v1  ;;  %s125_s25 = scalar_lea.vmem %s492_s1, %s124_s8  ;;  %s218_s3 = sshll.u32 %s380_s17, 7 }
  0x2a   : > { %117 = vst.msk [vmem:[%s101_s20 + $0x2] sm:$0x1] %vm106_vm0, %v116_v2  ;;  %v121_v3 = vld [vmem:[%s120_s10] sm:$0x1]  ;;  %s130_s4 = scalar_lea.vmem %s492_s1, %s129_s13  ;;  %s157_s12 = sshll.u32 %s101_s20, 4  ;;  %s448_s12 = int_to_ptr.vmem [resolvable:$true] %s157_s12 }
  0x2b   : > { %v126_v4 = vld [vmem:[%s125_s25] sm:$0x1]  ;;  %122 = vst.msk [vmem:[%s101_s20 + $0x3] sm:$0x1] %vm106_vm0, %v121_v3  ;;  %s442_s30 = scalar_lea.hbm %s493_s2, %s218_s3  ;;  %s273_s9 = scalar_lea.vmem %s448_s12, 128 }
  0x2c   : > { %127 = vst.msk [vmem:[%s101_s20 + $0x4] sm:$0x1] %vm106_vm0, %v126_v4  ;;  %v131_v5 = vld [vmem:[%s130_s4] sm:$0x1]  ;;  %s135_s29 = scalar_lea.vmem %s492_s1, %s134_s21  ;;  %s500_s21 = sand.u32 1, %s329_s15  }
  0x2d   : > { %132 = vst.msk [vmem:[%s101_s20 + $0x5] sm:$0x1] %vm106_vm0, %v131_v5  ;;  %v136_v6 = vld [vmem:[%s135_s29] sm:$0x1]  ;;  %s144_s27 = scalar_lea.sflag [#allocation5], %s500_s21  ;;  %p274_p1 = scmp.ne.s32.totalorder %s448_s12, %s273_s9 }
  0x2e   : > { %137 = vst.msk [vmem:[%s101_s20 + $0x6] sm:$0x1] %vm106_vm0, %v136_v6  ;;  %s140_s13 = scalar_lea.vmem %s492_s1, %s139_s28  ;;  %s340_s10 = smov [#allocation4]  }
  0x2f   : > { %v141_v7 = vld [vmem:[%s140_s13] sm:$0x1]  ;;  %p275_p2 = pnand %p274_p1, %p397_p10  ;;  %s277_s26 = sshll.u32 %s340_s10, 4  ;;  %s278_s26 = int_to_ptr.vmem [resolvable:$false] %s277_s26 }
  0x30   : > { %142 = vst.msk [vmem:[%s101_s20 + $0x7] sm:$0x1] %vm106_vm0, %v141_v7  ;;  %s279_s11 = scalar_lea.vmem %s278_s26, 256  ;;  %p280_p4 = scmp.lt.s32.totalorder %s448_s12, %s278_s26 }
  0x31   : > { %p276_p3 = pneg %p275_p2  ;;  %p281_p5 = scmp.lt.s32.totalorder %s279_s11, %s273_s9 }
  0x33   : > { %p282_p6 = por %p281_p5, %p280_p4 }
  0x35   : > { %p283_p7 = pnand %p282_p6, %p276_p3 }
  0x37   : > { %286 = shalt.err (!%p283_p7)
}
  0x38   : > { %s287_s20 = scalar_lea.hbm %s442_s30, 128  ;;  %s291_s3 = scalar_lea.hbm %s493_s2, 256 }
  0x39   : > { %p288_p8 = scmp.ne.s32.totalorder %s442_s30, %s287_s20  ;;  %p292_p13 = scmp.lt.u32.totalorder %s442_s30, %s493_s2 }
  0x3a   : > { %p293_p0 = scmp.lt.u32.totalorder %s291_s3, %s287_s20  ;;  %p295_p2 = scmp.lt.u32.totalorder %s287_s20, %s442_s30 }
  0x3b   : > { %p289_p9 = pnand %p288_p8, %p397_p10 }
  0x3c   : > { %p294_p1 = por %p293_p0, %p292_p13 }
  0x3d   : > { %p290_p12 = pneg %p289_p9 }
  0x3e   : > { %p296_p3 = por %p295_p2, %p294_p1 }
  0x40   : > { %p297_p4 = pnand %p296_p3, %p290_p12 }
  0x42   : > { %300 = shalt.err (!%p297_p4)
}
  0x43   : > { %221 = dma.vmem_to_hbm [thread:$0]  (%p397_p10), %s448_s12, 128, %s442_s30, %s144_s27  }
  0x44 PF: > { %p227_p5 = scmp.ge.s32.totalorder %s337_s16, 2  ;;  %s169_s4 = sand.u32 1, %s325_s14  }
  0x45   : > { %s170_s7 = scalar_lea.sflag [#allocation5], %s169_s4 }
  0x46   : > { %p224_p6 = pnand %p227_p5, %p401_p11 }
  0x48   : > { %320 = dma.done.wait (!%p224_p6), %s170_s7, 128  }
  0x49   : > { %322 = vsyncadd (!%p224_p6), %s170_s7, 4294967168  ;;  %s501_s18 = sld [smem:[#allocation8_spill]]  ;;  %s502_s0 = sld [smem:[#allocation9_spill]] }
  0x4a   : > { %p18_p7 = scmp.ge.s32.totalorder %s384_s19, 4   ;;  %s503_s14 = smov %s329_s15 }
  0x4b   : > { %s505_s16 = smov %s384_s19 }
  0x4c   :  { %20 = sbr.rel (!%p18_p7) target bundleno = 18 (0x12), region = 64 }
  0x4f   : > { %s504_s15 = smov %s501_s18 }
  0x53   :  { %175 = vsyncpa [#allocation5], 1 }
  0x54   :  { %177 = vsyncpa [#allocation5 + $0x1], 1 }

</bundles_post_ra>
